<compile_context>
chip_gen: v5e
topology: v5e:2x2
jax: 0.10.0
libtpu: 0.0.40
codegen_flags: <defaults>
</compile_context>

<pallas_src>
import math
from functools import partial

import jax
import jax.numpy as jnp
from jax import lax
from jax.experimental import pallas as pl
from jax.experimental.pallas import tpu as pltpu

_EPS = 1e-5


def _round_up(x, m):
    return ((x + m - 1) // m) * m


def _default_vmem_budget():
    """Chip-aware VMEM budget: ~100 MiB usable on v5e/v6e (128 MiB phys), ~48 MiB on v7x."""
    phys = 64 * 1024 * 1024          # conservative fallback (v7x-sized) if query fails
    try:
        info = pltpu.get_tpu_info()
        phys = int(getattr(info, "vmem_capacity_bytes", phys))
    except Exception:
        pass
    return max(16 * 1024 * 1024, min(phys - 16 * 1024 * 1024, 100 * 1024 * 1024))


# ------------------------------ Pallas kernels ------------------------------

def _fused_down_conv_kernel(g_ref, w_ref, b_ref, o_ref, *, leaky, eps, bt, e_pad, n_edges):
    """Conv2d(1,5)-as-matmul + bias + leaky_relu + InstanceNorm, whole E resident.

    g_ref: (bt, Epad, K)  gathered+symmetric features (channel-last, maybe bf16)
    w_ref: (K, Cout)      flattened Conv2d weight (maybe bf16)
    b_ref: (1, Cout)      Conv2d bias (f32)
    o_ref: (bt, Epad, Cout) normalized output (f32 or bf16)
    """
    K = g_ref.shape[-1]
    Cout = w_ref.shape[-1]
    # One large-M matmul: (bt*Epad, K) @ (K, Cout), f32 accumulation on the MXU.
    g = g_ref[...].reshape(bt * e_pad, K)
    y = jnp.dot(g, w_ref[...], preferred_element_type=jnp.float32) + b_ref[...]
    if leaky == 0.0:
        y = jnp.maximum(y, 0.0)
    else:
        y = jnp.where(y >= 0, y, leaky * y)
    y = y.reshape(bt, e_pad, Cout)

    if e_pad != n_edges:
        row = lax.broadcasted_iota(jnp.int32, (1, e_pad, 1), 1)
        ym = jnp.where(row < n_edges, y, 0.0)
    else:
        ym = y

    inv_e = 1.0 / float(n_edges)
    s = jnp.sum(ym, axis=1, keepdims=True)            # (bt, 1, Cout)
    ss = jnp.sum(ym * ym, axis=1, keepdims=True)      # (bt, 1, Cout)
    mean = s * inv_e
    var = jnp.maximum(ss * inv_e - mean * mean, 0.0)  # clamp: E[y^2]-mean^2 may go < 0
    o_ref[...] = ((y - mean) * lax.rsqrt(var + eps)).astype(o_ref.dtype)


def _conv_stats_kernel(g_ref, w_ref, b_ref, y_ref, s_ref, acc_ref,
                       *, leaky, tile_e, n_edges):
    """Tiled pass 1: conv + bias + leaky_relu; accumulate per-channel sum / sumsq.

    Grid (B, Epad//tile_e); E is a reduction ("arbitrary").  Sums are accumulated in an
    8-sublane VMEM scratch and flushed to the revisited (1,2,Cout) stats block only on
    the last E step.  Rows past the true edge count are masked out of the statistics.
    """
    e = pl.program_id(1)
    g = g_ref[0]                                          # (tE, K)
    y = jnp.dot(g, w_ref[...], preferred_element_type=jnp.float32) + b_ref[...]
    if leaky == 0.0:
        y = jnp.maximum(y, 0.0)
    else:
        y = jnp.where(y >= 0, y, leaky * y)
    y_ref[0] = y.astype(y_ref.dtype)                      # (possibly bf16) round-trip

    row = e * tile_e + lax.broadcasted_iota(jnp.int32, (tile_e, 1), 0)
    ym = jnp.where(row < n_edges, y, 0.0)

    @pl.when(e == 0)
    def _():
        acc_ref[...] = jnp.zeros_like(acc_ref)

    tile_stats = jnp.concatenate([jnp.sum(ym, axis=0, keepdims=True),
                                  jnp.sum(ym * ym, axis=0, keepdims=True)], axis=0)
    acc_ref[0:2, :] = acc_ref[0:2, :] + tile_stats

    @pl.when(e == pl.num_programs(1) - 1)
    def _():
        s_ref[0] = acc_ref[0:2, :]


def _norm_kernel(y_ref, s_ref, o_ref, *, eps, n_edges):
    """Tiled pass 2: InstanceNorm2d(affine=False) from the precomputed sum / sumsq."""
    inv_e = 1.0 / float(n_edges)
    y = y_ref[0].astype(jnp.float32)                      # (tE, Cout)
    mean = s_ref[0, 0:1, :] * inv_e
    var = jnp.maximum(s_ref[0, 1:2, :] * inv_e - mean * mean, 0.0)
    o_ref[0] = ((y - mean) * lax.rsqrt(var + eps)).astype(o_ref.dtype)


# ------------------------------ pallas_call wrappers ------------------------------

def _fused_path(g_flat, w_flat, bias, *, leaky, eps, bt, vmem_limit, out_dtype):
    B, E, K = g_flat.shape
    Cout = w_flat.shape[1]
    e_pad = _round_up(E, 8)            # pad so the (bt,Epad,K)->(bt*Epad,K) view is free
    if e_pad != E:
        g_flat = jnp.pad(g_flat, ((0, 0), (0, e_pad - E), (0, 0)))

    kern = partial(_fused_down_conv_kernel, leaky=leaky, eps=eps, bt=bt,
                   e_pad=e_pad, n_edges=E)
    out = pl.pallas_call(
        kern,
        out_shape=jax.ShapeDtypeStruct((B, e_pad, Cout), out_dtype),
        grid_spec=pltpu.PrefetchScalarGridSpec(
            num_scalar_prefetch=0,
            grid=(B // bt,),
            in_specs=[
                pl.BlockSpec((bt, e_pad, K), lambda b: (b, 0, 0)),
                pl.BlockSpec((K, Cout), lambda b: (0, 0)),
                pl.BlockSpec((1, Cout), lambda b: (0, 0)),
            ],
            out_specs=pl.BlockSpec((bt, e_pad, Cout), lambda b: (b, 0, 0)),
        ),
        compiler_params=pltpu.CompilerParams(
            dimension_semantics=("parallel",),
            vmem_limit_bytes=vmem_limit),
    )(g_flat, w_flat, bias)
    if e_pad != E:
        out = out[:, :E, :]
    return out


def _tiled_path(g_flat, w_flat, bias, *, leaky, eps, tile_e, vmem_limit,
                out_dtype, y_dtype, g_buffers=None):
    B, E, K = g_flat.shape
    Cout = w_flat.shape[1]
    e_pad = _round_up(E, tile_e)
    if e_pad != E:
        g_flat = jnp.pad(g_flat, ((0, 0), (0, e_pad - E), (0, 0)))
    n_e = e_pad // tile_e

    if g_buffers is not None and g_buffers > 2:
        # deeper pipelining of the dominant input stream (useful on v5e's lower HBM BW)
        g_spec = pl.BlockSpec((1, tile_e, K), lambda b, e: (b, e, 0),
                              pipeline_mode=pl.Buffered(int(g_buffers)))
        y_in_spec = pl.BlockSpec((1, tile_e, Cout), lambda b, e: (b, e, 0),
                                 pipeline_mode=pl.Buffered(int(g_buffers)))
    else:
        g_spec = pl.BlockSpec((1, tile_e, K), lambda b, e: (b, e, 0))
        y_in_spec = pl.BlockSpec((1, tile_e, Cout), lambda b, e: (b, e, 0))

    kern_a = partial(_conv_stats_kernel, leaky=leaky, tile_e=tile_e, n_edges=E)
    y, stats = pl.pallas_call(
        kern_a,
        out_shape=(jax.ShapeDtypeStruct((B, e_pad, Cout), y_dtype),
                   jax.ShapeDtypeStruct((B, 2, Cout), jnp.float32)),
        grid_spec=pltpu.PrefetchScalarGridSpec(
            num_scalar_prefetch=0,
            grid=(B, n_e),
            in_specs=[
                g_spec,
                pl.BlockSpec((K, Cout), lambda b, e: (0, 0)),
                pl.BlockSpec((1, Cout), lambda b, e: (0, 0)),
            ],
            out_specs=(
                pl.BlockSpec((1, tile_e, Cout), lambda b, e: (b, e, 0)),
                pl.BlockSpec((1, 2, Cout), lambda b, e: (b, 0, 0)),
            ),
            scratch_shapes=[pltpu.VMEM((8, Cout), jnp.float32)],
        ),
        compiler_params=pltpu.CompilerParams(
            dimension_semantics=("parallel", "arbitrary"),
            vmem_limit_bytes=vmem_limit),
    )(g_flat, w_flat, bias)

    kern_b = partial(_norm_kernel, eps=eps, n_edges=E)
    out = pl.pallas_call(
        kern_b,
        out_shape=jax.ShapeDtypeStruct((B, e_pad, Cout), out_dtype),
        grid_spec=pltpu.PrefetchScalarGridSpec(
            num_scalar_prefetch=0,
            grid=(B, n_e),
            in_specs=[
                y_in_spec,
                pl.BlockSpec((1, 2, Cout), lambda b, e: (b, 0, 0)),
            ],
            out_specs=pl.BlockSpec((1, tile_e, Cout), lambda b, e: (b, e, 0)),
        ),
        compiler_params=pltpu.CompilerParams(
            dimension_semantics=("parallel", "parallel"),
            vmem_limit_bytes=vmem_limit),
    )(y, stats)

    if e_pad != E:
        out = out[:, :E, :]
    return out


def down_conv_pallas(g_flat, w_flat, bias, *, leaky=0.0, eps=_EPS, mode="auto",
                     tile_e=None, vmem_budget_bytes=None, g_buffers=None,
                     out_dtype=jnp.float32, y_dtype=jnp.float32):
    """g_flat: (B, E, 5*Cin) channel-last gathered features; w_flat: (5*Cin, Cout);
    bias: (1, Cout) f32.  Returns (B, E, Cout) out_dtype (conv + leaky_relu + InstanceNorm)."""
    B, E, K = g_flat.shape
    Cout = w_flat.shape[1]
    if vmem_budget_bytes is None:
        vmem_budget_bytes = _default_vmem_budget()
    usable = int(0.7 * vmem_budget_bytes)

    g_item = jnp.dtype(g_flat.dtype).itemsize
    o_item = jnp.dtype(out_dtype).itemsize
    y_item = jnp.dtype(y_dtype).itemsize
    w_bytes = 2 * K * Cout * jnp.dtype(w_flat.dtype).itemsize + 2 * Cout * 4

    e_pad8 = _round_up(E, 8)
    # double-buffered in/out + f32 temporaries, per batch element at full Epad
    per_batch = (2 * e_pad8 * K * g_item + 2 * e_pad8 * Cout * o_item
                 + e_pad8 * (K + 3 * Cout) * 4)
    fused_fits = (w_bytes + per_batch) <= usable

    if mode == "auto":
        mode = "fused" if fused_fits else "tiled"
    if mode == "fused" and not fused_fits:
        mode = "tiled"                    # guard: forced fused must not blow VMEM

    if mode == "fused":
        bt_cap = min(B, 8)                # cap static fold
        if B > 1:
            bt_cap = min(bt_cap, max(1, B // 2))   # keep >=2 grid steps (v7x 2 TCs)
        bt = 1
        for cand in range(bt_cap, 0, -1):
            if B % cand == 0 and w_bytes + cand * per_batch <= usable:
                bt = cand
                break
        return _fused_path(g_flat, w_flat, bias, leaky=leaky, eps=eps, bt=bt,
                           vmem_limit=vmem_budget_bytes, out_dtype=out_dtype)

    # tiled: grow tile_e to fill VMEM (up to 2048 rows) unless the caller caps it
    cap = 2048 if tile_e is None else int(tile_e)
    te = max(8, (min(cap, e_pad8) // 8) * 8)

    def _tile_bytes(t):
        return (w_bytes + 2 * t * K * g_item + 2 * t * Cout * y_item
                + t * (K + 2 * Cout) * 4 + 8 * Cout * 4)

    while te > 8 and _tile_bytes(te) > usable:
        te = max(8, ((te // 2) // 8) * 8)

    return _tiled_path(g_flat, w_flat, bias, leaky=leaky, eps=eps, tile_e=te,
                       vmem_limit=vmem_budget_bytes, out_dtype=out_dtype,
                       y_dtype=y_dtype, g_buffers=g_buffers)


# ------------------------- JAX glue (MeshConv prep, channel-last) ------------------------

def build_gemm_features_cl(x_bec, gemm, out_dtype=None):
    """MeshConv.create_GeMM in channel-last layout.

    x_bec: (B, E, C) edge features; gemm: (B, E, 5) int32, column 0 the edge itself,
    columns 1..4 the one-ring neighbors (-1 for boundary -> zero pad row).
    Symmetric combos computed in f32; only the final tensor is cast to out_dtype.
    Returns (B, E, 5*C), tap-major flattening (tap * C + c).
    """
    B, E, C = x_bec.shape
    xpad = jnp.concatenate([jnp.zeros((B, 1, C), x_bec.dtype), x_bec], axis=1)
    idx = (gemm + 1).astype(jnp.int32)                      # shift so -1 -> pad row 0
    f = jax.vmap(lambda xp, ix: xp[ix])(xpad, idx).astype(jnp.float32)   # (B, E, 5, C)
    f0 = f[:, :, 0, :]
    x1 = f[:, :, 1, :] + f[:, :, 3, :]
    x2 = f[:, :, 2, :] + f[:, :, 4, :]
    x3 = jnp.abs(f[:, :, 1, :] - f[:, :, 3, :])
    x4 = jnp.abs(f[:, :, 2, :] - f[:, :, 4, :])
    g = jnp.stack([f0, x1, x2, x3, x4], axis=2).reshape(B, E, 5 * C)
    if out_dtype is not None:
        g = g.astype(out_dtype)
    return g


def mesh_encoder_forward(fe, gemm, params, *, leaky=0.0, eps=_EPS, use_bf16=True,
                         mode="auto", tile_e=None, vmem_budget_bytes=None, g_buffers=None):
    """MeshEncoder.forward with blocks=0 and pool=0 for every DownConv.

    fe: (B, C0, E) edge features (PyTorch layout).  gemm: (B, E, 5) int32 ("meshes").
    params: list of (W (Cout, Cin, 1, 5), b (Cout,)) per DownConv.
    Returns (fe (B, C_last, E) float32, encoder_outs) with encoder_outs[i] = None.
    """
    x = jnp.transpose(fe, (0, 2, 1))            # channel-last once, at the boundary only
    gather_dtype = jnp.bfloat16 if use_bf16 else jnp.float32
    y_dtype = jnp.bfloat16 if use_bf16 else jnp.float32
    n_layers = len(params)
    encoder_outs = []
    for li, (W, b) in enumerate(params):
        Cout, Cin = W.shape[0], W.shape[1]
        g_flat = build_gemm_features_cl(x, gemm, out_dtype=gather_dtype)   # (B, E, 5*Cin)
        w_flat = jnp.transpose(W[:, :, 0, :], (2, 1, 0)).reshape(5 * Cin, Cout)
        w_flat = w_flat.astype(gather_dtype)
        bias = b.reshape(1, Cout).astype(jnp.float32)
        last = (li == n_layers - 1)
        out_dtype = jnp.float32 if (last or not use_bf16) else jnp.bfloat16
        x = down_conv_pallas(g_flat, w_flat, bias, leaky=leaky, eps=eps, mode=mode,
                             tile_e=tile_e, vmem_budget_bytes=vmem_budget_bytes,
                             g_buffers=g_buffers, out_dtype=out_dtype,
                             y_dtype=y_dtype)                              # (B, E, Cout)
        encoder_outs.append(None)               # before_pool is None since pool=0
    return jnp.transpose(x, (0, 2, 1)), encoder_outs


# --------------------------- pure-JAX reference ----------------------------

def build_gemm_features_ref(x_bce, gemm):
    B, C, E = x_bce.shape
    xpad = jnp.concatenate([jnp.zeros((B, C, 1), x_bce.dtype), x_bce], axis=2)
    idx = (gemm + 1).astype(jnp.int32)
    f = jax.vmap(lambda xp, ix: xp[:, ix])(xpad, idx)       # (B, C, E, 5)
    f0 = f[..., 0]
    x1 = f[..., 1] + f[..., 3]
    x2 = f[..., 2] + f[..., 4]
    x3 = jnp.abs(f[..., 1] - f[..., 3])
    x4 = jnp.abs(f[..., 2] - f[..., 4])
    return jnp.stack([f0, x1, x2, x3, x4], axis=3)          # (B, C, E, 5)


def reference_forward(fe, gemm, params, *, leaky=0.0, eps=_EPS):
    for (W, b) in params:
        G = build_gemm_features_ref(fe, gemm)
        y = jnp.einsum("bcek,ock->boe", G, W[:, :, 0, :]) + b[None, :, None]
        y = jnp.where(y >= 0, y, leaky * y)
        mean = jnp.mean(y, axis=2, keepdims=True)
        var = jnp.mean((y - mean) ** 2, axis=2, keepdims=True)
        fe = (y - mean) * lax.rsqrt(var + eps)
    return fe


# ------------------------------- init / main -------------------------------

def init_params(key, convs):
    """reset_params: xavier_normal_ on each Conv2d weight, bias zero."""
    params = []
    for i in range(len(convs) - 1):
        cin, cout = convs[i], convs[i + 1]
        key, sub = jax.random.split(key)
        fan_in, fan_out = cin * 1 * 5, cout * 1 * 5
        std = math.sqrt(2.0 / (fan_in + fan_out))
        W = std * jax.random.normal(sub, (cout, cin, 1, 5), dtype=jnp.float32)
        b = jnp.zeros((cout,), jnp.float32)
        params.append((W, b))
    return params


if __name__ == "__main__":
    key = jax.random.PRNGKey(0)
    B, E = 2, 16                      # batch, number of mesh edges
    convs = [4, 16, 32]               # MeshEncoder(convs=...) -> two DownConv layers
    k_fe, k_g, k_p, k_fe2, k_g2 = jax.random.split(key, 5)

    fe = jax.random.normal(k_fe, (B, convs[0], E), dtype=jnp.float32)
    neigh = jax.random.randint(k_g, (B, E, 4), -1, E, dtype=jnp.int32)  # -1 = boundary
    edge_ids = jnp.broadcast_to(jnp.arange(E, dtype=jnp.int32)[None, :, None], (B, E, 1))
    gemm = jnp.concatenate([edge_ids, neigh], axis=2)                   # (B, E, 5)
    params = init_params(k_p, convs)

    ref = reference_forward(fe, gemm, params, leaky=0.0)

    # 1) fused single-pass path, f32 end-to-end (strict check)
    out_fe, encoder_outs = mesh_encoder_forward(fe, gemm, params, leaky=0.0, use_bf16=False)
    out_fe = jax.block_until_ready(out_fe)
    assert out_fe.shape == (B, convs[-1], E)
    assert all(o is None for o in encoder_outs)
    assert jnp.allclose(out_fe, ref, atol=1e-4, rtol=1e-4)

    # 2) tiled two-pass path (E tiling + scratch accumulator), f32, forced at a tiny tile
    out_tiled, _ = mesh_encoder_forward(fe, gemm, params, leaky=0.0, use_bf16=False,
                                        mode="tiled", tile_e=8)
    out_tiled = jax.block_until_ready(out_tiled)
    assert jnp.allclose(out_tiled, ref, atol=1e-4, rtol=1e-4)

    # 3) ragged edge count -> padded last tile must be masked out of the norm statistics
    E2 = 20
    fe2 = jax.random.normal(k_fe2, (B, convs[0], E2), dtype=jnp.float32)
    neigh2 = jax.random.randint(k_g2, (B, E2, 4), -1, E2, dtype=jnp.int32)
    edge_ids2 = jnp.broadcast_to(jnp.arange(E2, dtype=jnp.int32)[None, :, None], (B, E2, 1))
    gemm2 = jnp.concatenate([edge_ids2, neigh2], axis=2)
    ref2 = reference_forward(fe2, gemm2, params, leaky=0.0)
    out2, _ = mesh_encoder_forward(fe2, gemm2, params, leaky=0.0, use_bf16=False,
                                   mode="tiled", tile_e=8)
    out2 = jax.block_until_ready(out2)
    assert out2.shape == (B, convs[-1], E2)
    assert jnp.allclose(out2, ref2, atol=1e-4, rtol=1e-4)

    # 3b) ragged edge count on the fused path too (E padded to a multiple of 8 + masked)
    out2f, _ = mesh_encoder_forward(fe2, gemm2, params, leaky=0.0, use_bf16=False)
    out2f = jax.block_until_ready(out2f)
    assert jnp.allclose(out2f, ref2, atol=1e-4, rtol=1e-4)

    # 4) default config: bf16 MXU operands + bf16 intermediate-layer outputs,
    #    f32 accumulation/statistics/epilogue -- loose tolerance
    out_bf16, _ = mesh_encoder_forward(fe, gemm, params, leaky=0.0)
    out_bf16 = jax.block_until_ready(out_bf16)
    assert out_bf16.dtype == jnp.float32
    assert bool(jnp.all(jnp.isfinite(out_bf16)))
    assert jnp.allclose(out_bf16, ref, atol=0.1, rtol=0.1)

    # 5) bf16 tiled path (bf16 y round-trip) -- loose tolerance
    out_bf16_t, _ = mesh_encoder_forward(fe, gemm, params, leaky=0.0, mode="tiled", tile_e=8)
    out_bf16_t = jax.block_until_ready(out_bf16_t)
    assert jnp.allclose(out_bf16_t, ref, atol=0.1, rtol=0.1)

    print("KERNEL_OK")
</pallas_src>

<mosaic_0001>
module attributes {stable_mosaic.version = 11 : i64} {
  func.func @_fused_down_conv_kernel(%arg0: i32, %arg1: memref<1x16x20xf32, #tpu.memory_space<vmem>>, %arg2: memref<20x16xf32, #tpu.memory_space<vmem>>, %arg3: memref<1x16xf32, #tpu.memory_space<vmem>>, %arg4: memref<1x16x16xf32, #tpu.memory_space<vmem>>) attributes {dimension_semantics = [#tpu.dimension_semantics<parallel>], iteration_bounds = array<i64: 2>, scalar_prefetch = 0 : i64, scratch_operands = 0 : i64, tpu.core_type = #tpu.core_type<tc>, window_params = [{transform_indices = @transform_0, window_bounds = array<i64: 1, 16, 20>}, {pipeline_mode = #tpu.pipeline_mode<synchronous>, transform_indices = @transform_1, window_bounds = array<i64: 20, 16>}, {pipeline_mode = #tpu.pipeline_mode<synchronous>, transform_indices = @transform_2, window_bounds = array<i64: 1, 16>}, {transform_indices = @transform_3, window_bounds = array<i64: 1, 16, 16>}]} {
    %c0 = arith.constant 0 : index
    %c0_0 = arith.constant 0 : index
    %c0_1 = arith.constant 0 : index
    %0 = vector.load %arg1[%c0, %c0_0, %c0_1] : memref<1x16x20xf32, #tpu.memory_space<vmem>>, vector<1x16x20xf32>
    %1 = vector.shape_cast %0 : vector<1x16x20xf32> to vector<16x20xf32>
    %c0_2 = arith.constant 0 : index
    %c0_3 = arith.constant 0 : index
    %2 = vector.load %arg2[%c0_2, %c0_3] : memref<20x16xf32, #tpu.memory_space<vmem>>, vector<20x16xf32>
    %cst = arith.constant dense<0.000000e+00> : vector<16x16xf32>
    %3 = tpu.matmul %1, %2, %cst {dimension_numbers = #tpu.dot_dimension_numbers<[1], [0], [0], [1], [0, 0, 1, 1], [], []>} : vector<16x20xf32>, vector<20x16xf32>, vector<16x16xf32> -> vector<16x16xf32>
    %c0_4 = arith.constant 0 : index
    %c0_5 = arith.constant 0 : index
    %4 = vector.load %arg3[%c0_4, %c0_5] : memref<1x16xf32, #tpu.memory_space<vmem>>, vector<1x16xf32>
    %5 = vector.broadcast %4 : vector<1x16xf32> to vector<16x16xf32>
    %6 = arith.addf %3, %5 : vector<16x16xf32>
    %cst_6 = arith.constant 0.000000e+00 : f32
    %7 = vector.broadcast %cst_6 : f32 to vector<16x16xf32>
    %8 = arith.maximumf %6, %7 : vector<16x16xf32>
    %9 = vector.shape_cast %8 : vector<16x16xf32> to vector<1x16x16xf32>
    %cst_7 = arith.constant dense<0.000000e+00> : vector<1x16xf32>
    %10 = vector.multi_reduction <add>, %9, %cst_7 [1] : vector<1x16x16xf32> to vector<1x16xf32>
    %11 = vector.shape_cast %10 : vector<1x16xf32> to vector<1x1x16xf32>
    %12 = arith.mulf %9, %9 : vector<1x16x16xf32>
    %cst_8 = arith.constant dense<0.000000e+00> : vector<1x16xf32>
    %13 = vector.multi_reduction <add>, %12, %cst_8 [1] : vector<1x16x16xf32> to vector<1x16xf32>
    %14 = vector.shape_cast %13 : vector<1x16xf32> to vector<1x1x16xf32>
    %cst_9 = arith.constant 6.250000e-02 : f32
    %15 = vector.broadcast %cst_9 : f32 to vector<1x1x16xf32>
    %16 = arith.mulf %11, %15 : vector<1x1x16xf32>
    %cst_10 = arith.constant 6.250000e-02 : f32
    %17 = vector.broadcast %cst_10 : f32 to vector<1x1x16xf32>
    %18 = arith.mulf %14, %17 : vector<1x1x16xf32>
    %19 = arith.mulf %16, %16 : vector<1x1x16xf32>
    %20 = arith.subf %18, %19 : vector<1x1x16xf32>
    %cst_11 = arith.constant 0.000000e+00 : f32
    %21 = vector.broadcast %cst_11 : f32 to vector<1x1x16xf32>
    %22 = arith.maximumf %20, %21 : vector<1x1x16xf32>
    %23 = vector.broadcast %16 : vector<1x1x16xf32> to vector<1x16x16xf32>
    %24 = arith.subf %9, %23 : vector<1x16x16xf32>
    %cst_12 = arith.constant 9.99999974E-6 : f32
    %25 = vector.broadcast %cst_12 : f32 to vector<1x1x16xf32>
    %26 = arith.addf %22, %25 : vector<1x1x16xf32>
    %27 = math.rsqrt %26 : vector<1x1x16xf32>
    %28 = vector.broadcast %27 : vector<1x1x16xf32> to vector<1x16x16xf32>
    %29 = arith.mulf %24, %28 : vector<1x16x16xf32>
    %c0_13 = arith.constant 0 : index
    %c0_14 = arith.constant 0 : index
    %c0_15 = arith.constant 0 : index
    %30 = vector.load %arg4[%c0_13, %c0_14, %c0_15] : memref<1x16x16xf32, #tpu.memory_space<vmem>>, vector<1x16x16xf32>
    tpu.vector_store %arg4[%c0_13, %c0_14, %c0_15], %29 {strides = array<i32>} : memref<1x16x16xf32, #tpu.memory_space<vmem>>, vector<1x16x16xf32>,
    return
  }
  func.func @transform_0(%arg0: i32) -> (i32, i32, i32) {
    %c0_i32 = arith.constant 0 : i32
    %c0_i32_0 = arith.constant 0 : i32
    %c0_i32_1 = arith.constant 0 : i32
    return %arg0, %c0_i32, %c0_i32_0 : i32, i32, i32
  }
  func.func @transform_1(%arg0: i32) -> (i32, i32) {
    %c0_i32 = arith.constant 0 : i32
    %c0_i32_0 = arith.constant 0 : i32
    %c0_i32_1 = arith.constant 0 : i32
    return %c0_i32, %c0_i32_0 : i32, i32
  }
  func.func @transform_2(%arg0: i32) -> (i32, i32) {
    %c0_i32 = arith.constant 0 : i32
    %c0_i32_0 = arith.constant 0 : i32
    %c0_i32_1 = arith.constant 0 : i32
    return %c0_i32, %c0_i32_0 : i32, i32
  }
  func.func @transform_3(%arg0: i32) -> (i32, i32, i32) {
    %c0_i32 = arith.constant 0 : i32
    %c0_i32_0 = arith.constant 0 : i32
    %c0_i32_1 = arith.constant 0 : i32
    return %arg0, %c0_i32, %c0_i32_0 : i32, i32, i32
  }
}

</mosaic_0001>

<bundles_post_ra>
// kernel: tpu_custom_call.1
= control target key start
LH: loop header
LB: loop body
LE: loop exit
PB: predicated region body
PF: predicated region fallthrough
CT: control target
= control target key end

     0   :  { %8 = vsyncpa [#allocation3], 0  ;;  %s588_s0 = inlined_call_operand.vmem [shape: f32[2,16,20], index: 0, kind: input, shape index: {}]   ;;  %s589_s1 = inlined_call_operand.vmem [shape: f32[20,16], index: 1, kind: input, shape index: {}]   ;;  %s590_s2 = inlined_call_operand.vmem [shape: f32[1,16], index: 2, kind: input, shape index: {}]   ;;  %s591_s3 = inlined_call_operand.hbm [shape: f32[2,16,16], index: 3, kind: output, shape index: {}]  }
   0x1   :  { %10 = vsyncpa [#allocation3 + $0x1], 0  ;;  %s485_s12 = smov 0   ;;  %s487_s13 = smov 0  }
   0x2   :  { %s489_s14 = smov 0   ;;  %s491_s15 = smov 0  }
   0x3 LB: > { %s506_s16 = sadd.s32 4294967295, %s461_s15   ;;  %s335_s17 = sadd.s32 4294967294, %s461_s15   ;;  %s461_s15 = sphi %s491_s15, %s597_s15   ;;  %s457_s14 = sphi %s489_s14, %s596_s14   ;;  %s453_s13 = sphi %s487_s13, %s595_s13   ;;  %s449_s12 = sphi %s485_s12, %s594_s12  }
   0x4   : > { %s510_s18 = sadd.s32 1, %s461_s15   ;;  %s91_s19 = sadd.s32 1, %s457_s14 }
   0x5   : > { %s88_s20 = ssub.s32 %s461_s15, %s510_s18  ;;  %p101_p0 = scmp.ne.s32.totalorder %s457_s14, %s453_s13 }
   0x6   : > { %p89_p1 = scmp.eq.s32.totalorder %s88_s20, 0  ;;  %p102_p2 = scmp.eq.s32.totalorder %s506_s16, 1 }
   0x7   : > { %p107_p3 = scmp.ne.s32.totalorder %s453_s13, %s449_s12  ;;  %p108_p4 = scmp.eq.s32.totalorder %s335_s17, 1 }
   0x8   : > { %s521_s21 = scalar_select %p89_p1, %s457_s14, %s91_s19  }
   0x9   : > { %p523_p5 = por %p102_p2, %p101_p0  ;;  %p527_p6 = por %p108_p4, %p107_p3 }
   0xa   : > { %p338_p7 = scmp.ge.s32.totalorder %s461_s15, 1  ;;  %p140_p8 = scmp.lt.s32.totalorder %s461_s15, 3 }
   0xc   : > { %p141_p9 = pnand %p338_p7, %p140_p8 }
   0xd   : > { %p164_p10 = scmp.lt.s32.totalorder (!%p141_p9), %s506_s16, 1  ;;  %s161_s10 = sand.u32 (!%p141_p9), 1, %s453_s13  }
   0xe   : > { %144 = sbr.rel (%p141_p9) target bundleno = 205 (0xcd), region = 32  ;;  %s339_s11 = sshll.u32 (!%p141_p9), %s161_s10, 4 }
   0xf   : > { %s351_s17 = sshll.u32 (!%p141_p9), %s506_s16, 4  ;;  %s163_s25 = scalar_lea.vmem (!%p141_p9), [#allocation2], %s339_s11 }
  0x10   : > { %s269_s24 = scalar_lea.hbm (!%p141_p9), %s591_s3, %s351_s17  ;;  %s270_s26 = sshll.u32 (!%p141_p9), %s163_s25, 4  ;;  %s271_s26 = int_to_ptr.vmem [resolvable:$true] %s270_s26 }
  0x11   : > { %s272_s27 = sshll.u32 (!%p141_p9), %s269_s24, 4  ;;  %s419_s5 = scalar_lea.hbm (!%p141_p9), %s591_s3, 32  ;;  %s273_s27 = int_to_ptr.hbm [resolvable:$true] %s272_s27 }
  0x12   : > { %s413_s28 = sshra.s32 (!%p141_p9), %s273_s27, 4  ;;  %s414_s28 = int_to_ptr.hbm [resolvable:$true] %s413_s28 }
  0x13   : > { %v173_v0 = vld [vmem:[%s589_s1 + $0x10] sm:$0xf]  ;;  %vm185_vm0 = vcmask 1043456   ;;  %v172_v1 = vld [vmem:[%s589_s1 + $0x8] sm:$0xff]  ;;  %v171_v2 = vld [vmem:[%s589_s1] sm:$0xff]  ;;  %s165_s30 = scalar_select %p164_p10, %s506_s16, 1 }
  0x14   : > { %342 = vmatpush.msk.msra.mxu0 %vm185_vm0, %v173_v0  ;;  %352 = vmatpush.msk.msra.mxu1 %vm185_vm0, %v173_v0  ;;  %vm178_vm1 = vcmask 162816   ;;  %v396_v5 = vld [vmem:[%s590_s2] ss:$0 sm:$0xff]  ;;  %vm214_vm2 = vcmask 130048   ;;  %s258_s16 = scalar_lea.sflag [#allocation3], %s161_s10  ;;  %s415_s29 = scalar_lea.hbm %s414_s28, 16 }
  0x15   : > { %s350_s4 = sshll.u32 %s165_s30, 4  ;;  %p416_p11 = scmp.ne.s32.totalorder %s414_s28, %s415_s29 }
  0x16   : > { %203 = vmatpush.msra.mxu0 %v172_v1  ;;  %353 = vmatpush.msra.mxu1 %v172_v1  ;;  %s168_s7 = scalar_lea.vmem %s588_s0, %s350_s4  ;;  %p420_p0 = scmp.lt.s32.totalorder %s414_s28, %s591_s3 }
  0x17   : > { %v169_v3 = vld [vmem:[%s168_s7] sm:$0xff]  ;;  %v170_v4 = vld [vmem:[%s168_s7 + $0x8] sm:$0xff]  ;;  %p417_p12 = pnand %p416_p11, %p523_p5  ;;  %p421_p1 = scmp.lt.s32.totalorder %s419_s5, %s415_s29 }
  0x18   : > { %204 = vmatpush.msra.mxu0 %v171_v2  ;;  %354 = vmatpush.msra.mxu1 %v171_v2 }
  0x19   : > { %343 = vmatmul.msk.f32.vlgmr.msra.gmra.mxu0 %vm178_vm1, %v169_v3  ;;  %344 = vmatmul.msk.f32.vlgmr.msra.gmra.mxu1 %vm178_vm1, %v170_v4  ;;  %p418_p13 = pneg %p417_p12  ;;  %p422_p2 = por %p421_p1, %p420_p0 }
  0x1b   : > { %p423_p3 = pnand %p422_p2, %p418_p13 }
  0x96   : > { %v206_v6 = vpop.f32.mrf.mxu0  ;;  %v209_v7 = vpop.f32.mrf.mxu1 }
  0x97   : > { %v207_v8 = vadd.f32 %v396_v5, %v206_v6  ;;  %v210_v9 = vadd.f32 %v396_v5, %v209_v7 }
  0x99   : > { %v212_v10 = vmax.f32 %v207_v8, 0.0  ;;  %v213_v11 = vmax.f32 %v210_v9, 0.0 }
  0x9b   : > { %v215_v12 = vsel %vm214_vm2, %v212_v10, 0.0  ;;  %v224_v13 = vmul.f32 %v212_v10, %v212_v10  ;;  %v216_v14 = vsel %vm214_vm2, %v213_v11, 0.0  ;;  %v225_v15 = vmul.f32 %v213_v11, %v213_v11 }
  0x9c   : > { %v217_v16 = vadd.f32 %v216_v14, %v215_v12 }
  0x9d   : > { %v226_v17 = vsel %vm214_vm2, %v224_v13, 0.0  ;;  %v227_v18 = vsel %vm214_vm2, %v225_v15, 0.0 }
  0x9e   : > { %v218_v19 = vrot.slane %v217_v16, 4  ;;  %v228_v20 = vadd.f32 %v227_v18, %v226_v17 }
  0xa0   : > { %v219_v21 = vadd.f32 %v218_v19, %v217_v16  ;;  %v229_v22 = vrot.slane %v228_v20, 4 }
  0xa2   : > { %v220_v23 = vrot.slane %v219_v21, 2  ;;  %v230_v24 = vadd.f32 %v229_v22, %v228_v20 }
  0xa4   : > { %v221_v25 = vadd.f32 %v220_v23, %v219_v21  ;;  %v231_v26 = vrot.slane %v230_v24, 2 }
  0xa6   : > { %v222_v27 = vrot.slane %v221_v25, 1  ;;  %v232_v28 = vadd.f32 %v231_v26, %v230_v24 }
  0xa8   : > { %v223_v29 = vadd.f32 %v222_v27, %v221_v25  ;;  %v233_v30 = vrot.slane %v232_v28, 1 }
  0xaa   : > { %v234_v31 = vadd.f32 %v233_v30, %v232_v28  ;;  %v235_v32 = vmul.f32 0.0625, %v223_v29 }
  0xac   : > { %v236_v33 = vmul.f32 0.0625, %v234_v31  ;;  %v237_v34 = vmul.f32 %v235_v32, %v235_v32  ;;  %v240_v44 = vsub.f32 %v212_v10, %v235_v32  ;;  %v241_v45 = vsub.f32 %v213_v11, %v235_v32 }
  0xae   : > { %v238_v35 = vsub.f32 %v236_v33, %v237_v34 }
  0xb0   : > { %v239_v36 = vmax.f32 %v238_v35, 0.0 }
  0xb2   : > { %v242_v37 = vadd.f32 1e-05, %v239_v36 }
  0xb4   : > { %397 = vrsqrt.f32 %v242_v37  ;;  %vm249_vm4 = vweird.f32 %v242_v37 }
  0xba   : > { %v398_v38 = vpop.eup %397 }
  0xbb   : > { %v244_v39 = vmul.f32 %v398_v38, %v242_v37  ;;  %vm250_vm3 = vweird.f32 %v398_v38 }
  0xbc   : > { %vm251_vm5 = vmor %vm249_vm4, %vm250_vm3 }
  0xbd   : > { %v245_v40 = vmul.f32 %v398_v38, %v244_v39 }
  0xbf   : > { %v246_v41 = vmul.f32 0.5, %v245_v40 }
  0xc1   : > { %v247_v42 = vsub.f32 1.5, %v246_v41 }
  0xc3   : > { %v248_v43 = vmul.f32 %v398_v38, %v247_v42 }
  0xc5   : > { %v252_v46 = vsel %vm251_vm5, %v398_v38, %v248_v43 }
  0xc6   : > { %v253_v47 = vmul.f32 %v252_v46, %v240_v44  ;;  %v254_v48 = vmul.f32 %v252_v46, %v241_v45 }
  0xc8   : > { %255 = vst.msk [vmem:[%s163_s25] sm:$0xff] %vm214_vm2, %v253_v47 }
  0xc9   : > { %256 = vst.msk [vmem:[%s163_s25 + $0x8] sm:$0xff] %vm214_vm2, %v254_v48 }
  0xca   : > { %426 = shalt.err (!%p423_p3)
}
  0xcb   : > { %s463_s8 = smov 128   ;;  %s464_s9 = smov 8  }
  0xcc   : > { %355 = dma.vmem_to_hbm [thread:$0]  (%p523_p5), %s271_s26, 256, %s273_s27, %s258_s16, %s463_s8, %s463_s8, %s464_s9  }
  0xcd PF: > { %p361_p4 = scmp.ge.s32.totalorder %s461_s15, 2  ;;  %s287_s10 = sand.u32 1, %s449_s12  }
  0xce   : > { %s288_s11 = scalar_lea.sflag [#allocation3], %s287_s10 }
  0xcf   : > { %p358_p7 = pnand %p361_p4, %p527_p6 }
  0xd1   : > { %p359_p8 = pneg %p358_p7 }
  0xd3   : > { %444 = dma.done.wait (%p359_p8), %s288_s11, 256  }
  0xd4   : > { %446 = vsyncadd (%p359_p8), %s288_s11, 4294967040  ;;  %p13_p9 = scmp.ge.s32.totalorder %s510_s18, 4   ;;  %s594_s12 = smov %s453_s13 }
  0xd5   : > { %s595_s13 = smov %s457_s14  ;;  %s596_s14 = smov %s521_s21 }
  0xd6   : > { %s597_s15 = smov %s510_s18  ;;  %15 = sbr.rel (!%p13_p9) target bundleno = 3 (0x3), region = 67 }
  0xdb   :  { %294 = vsyncpa [#allocation3], 1 }
  0xdc   :  { %296 = vsyncpa [#allocation3 + $0x1], 1 }

</bundles_post_ra>
